<compile_context>
chip_gen: v6e
topology: v6e:2x2x1
jax: 0.10.0
libtpu: 0.0.40
codegen_flags: <defaults>
</compile_context>

<pallas_src>
import functools

import jax
import jax.numpy as jnp
from jax.experimental import pallas as pl
from jax.experimental.pallas import tpu as pltpu


def _round_up(x, m):
    return (x + m - 1) // m * m


# ----------------------------------------------------------------------------
# Kernel 1: fused linear transform (features + attention projections)
# ----------------------------------------------------------------------------
def _linear_kernel(x_ref, w_ref, o_ref):
    # One MXU matmul per row tile: bf16 [T, F_in] @ bf16 [F_in, K] -> f32 [T, K].
    o_ref[...] = jnp.dot(x_ref[...], w_ref[...],
                         preferred_element_type=jnp.float32)


def _linear(x, w, *, row_tile=256):
    """[N, F_in] @ [F_in, K] with bf16 MXU operands and f32 accumulation."""
    n, f_in = x.shape
    k = w.shape[1]
    x = x.astype(jnp.bfloat16)
    w = w.astype(jnp.bfloat16)
    t = min(row_tile, _round_up(n, 8))
    n_p = _round_up(n, t)
    if n_p != n:
        x = jnp.pad(x, ((0, n_p - n), (0, 0)))
    out = pl.pallas_call(
        _linear_kernel,
        out_shape=jax.ShapeDtypeStruct((n_p, k), jnp.float32),
        grid=(n_p // t,),
        in_specs=[pl.BlockSpec((t, f_in), lambda i: (i, 0)),
                  pl.BlockSpec((f_in, k), lambda i: (0, 0))],
        out_specs=pl.BlockSpec((t, k), lambda i: (i, 0)),
        compiler_params=pltpu.CompilerParams(
            dimension_semantics=("parallel",)),
        cost_estimate=pl.CostEstimate(
            flops=int(2 * n_p * f_in * k), transcendentals=0,
            bytes_accessed=int(2 * (n_p * f_in + f_in * k) + 4 * n_p * k)),
    )(x, w)
    return out[:n]


# ----------------------------------------------------------------------------
# Kernel 2: per-dst-tile attention softmax + per-head aggregation
# ----------------------------------------------------------------------------
def _gat_attn_kernel(mask_ref, a_dst_ref, a_src_ref, xs_ref, bias_ref, out_ref,
                     *, heads, per_head_ch, concat, apply_elu,
                     apply_log_softmax):
    c = per_head_ch
    mask = mask_ref[...].astype(jnp.float32)   # [T, Ns] additive: 0 / -1e30
    a_d = a_dst_ref[...]                        # [T, H]   f32
    a_s = a_src_ref[...]                        # [H, Ns]  f32
    xs = xs_ref[...]                            # [Ns, H*C] bf16 (lane-dense)

    # Statically unrolled head loop: only one [T, Ns] logits/probs slab live
    # at a time.  TODO(synk): flash-style src-chunk streaming for huge N_src.
    head_outs = []
    for h in range(heads):
        e = a_d[:, h:h + 1] + a_s[h:h + 1, :]   # [T, Ns]
        e = jnp.maximum(e, 0.2 * e)             # leaky_relu(0.2)
        e = e + mask                            # mask non-edges (one add)
        m = jnp.max(e, axis=-1, keepdims=True)  # [T, 1]
        p = jnp.exp(e - m)                      # masked entries underflow to 0
        s = jnp.sum(p, axis=-1, keepdims=True)  # [T, 1]
        agg = jnp.dot(p.astype(jnp.bfloat16), xs[:, h * c:(h + 1) * c],
                      preferred_element_type=jnp.float32)   # [T, C]
        head_outs.append(agg / s)               # exact softmax normalization

    if concat:
        out = (head_outs[0] if heads == 1
               else jnp.concatenate(head_outs, axis=-1))    # [T, H*C]
    else:
        out = head_outs[0]
        for h in range(1, heads):
            out = out + head_outs[h]
        if heads > 1:
            out = out * (1.0 / heads)                       # mean over heads

    out = out + bias_ref[...]                   # bias [1, H*C] or [1, C]
    if apply_elu:
        # ELU(alpha=1); clamp so exp never sees large positive lanes.
        out = jnp.where(out > 0.0, out,
                        jnp.exp(jnp.minimum(out, 0.0)) - 1.0)
    if apply_log_softmax:
        m2 = jnp.max(out, axis=-1, keepdims=True)
        lse = jnp.log(jnp.sum(jnp.exp(out - m2), axis=-1, keepdims=True)) + m2
        out = out - lse
    out_ref[...] = out                          # lane-dense [T, H*C] / [T, C]


def _attn_vmem_limit(t, n_src, h, c):
    """Generation-aware VMEM budget: never below the default, capped by HW."""
    est = (2 * t * n_src * 2            # double-buffered bf16 mask tiles
           + 2 * n_src * h * c * 2      # xs slab (bf16)
           + 2 * h * n_src * 4          # a_src
           + 2 * t * h * 4              # a_dst tiles
           + 2 * t * h * c * 4          # output tiles
           + 4 * t * n_src * 4)         # live logits/probs temporaries
    try:
        cap = int(pltpu.get_tpu_info().vmem_capacity_bytes)
    except Exception:
        cap = 64 * 1024 * 1024          # conservative (v7x per-core) fallback
    return int(min(max(2 * est, 32 * 1024 * 1024), int(cap * 0.85)))


def gat_conv(x_src, attn_bias, params, *, n_dst, heads, out_ch, concat,
             apply_elu=False, apply_log_softmax=False, dst_tile=128):
    """One PyG-style GATConv layer.

    x_src:     [N_src, F_in] node features (dst nodes = first n_dst src rows)
    attn_bias: [n_dst, N_src] additive mask (0 on edges incl. self loops,
               -1e30 elsewhere); streamed as bf16.
    """
    n_src, f_in = x_src.shape
    h, c = heads, out_ch

    w = params["w"]                                    # [F_in, H*C]
    att_src = params["att_src"]                        # [H, C]
    att_dst = params["att_dst"]                        # [H, C]
    bias = params["bias"]                              # [H*C] or [C]

    # Fold the per-head attention projections into the feature transform so a
    # single MXU pass yields x@W, <x@W, a_src>_h and <x@W, a_dst>_h.
    w3 = w.reshape(f_in, h, c)
    w_as = jnp.einsum('fhc,hc->fh', w3, att_src)       # [F_in, H]
    w_ad = jnp.einsum('fhc,hc->fh', w3, att_dst)       # [F_in, H]
    w_ext = jnp.concatenate([w, w_as, w_ad], axis=1)   # [F_in, H*C + 2H]
    k = w_ext.shape[1]
    k_p = _round_up(k, 128)                            # lane-dense stores
    if k_p != k:
        w_ext = jnp.pad(w_ext, ((0, 0), (0, k_p - k)))

    z = _linear(x_src, w_ext)                          # Pallas kernel 1
    xs = z[:, :h * c].astype(jnp.bfloat16)             # [N_src, H*C] lane-dense
    a_src_h = jnp.transpose(z[:, h * c:h * c + h])     # [H, N_src]
    a_dst = z[:n_dst, h * c + h:h * c + 2 * h]         # [N_dst, H]

    # dst tiling: 1-D grid; "parallel" lets v7x shard tiles across its 2 TCs.
    t = min(dst_tile, _round_up(n_dst, 8))
    n_dst_p = _round_up(n_dst, t)
    attn_bias = attn_bias.astype(jnp.bfloat16)
    if n_dst_p != n_dst:
        pad = n_dst_p - n_dst
        a_dst = jnp.pad(a_dst, ((0, pad), (0, 0)))
        # Padded rows get a 0 bias everywhere -> finite garbage, sliced away.
        attn_bias = jnp.pad(attn_bias, ((0, pad), (0, 0)))

    out_cols = h * c if concat else c
    bias2 = bias.reshape(1, out_cols)

    kernel = functools.partial(
        _gat_attn_kernel, heads=h, per_head_ch=c, concat=concat,
        apply_elu=apply_elu, apply_log_softmax=apply_log_softmax)

    out = pl.pallas_call(
        kernel,
        out_shape=jax.ShapeDtypeStruct((n_dst_p, out_cols), jnp.float32),
        grid=(n_dst_p // t,),
        in_specs=[
            pl.BlockSpec((t, n_src), lambda i: (i, 0)),       # mask tile (bf16)
            pl.BlockSpec((t, h), lambda i: (i, 0)),           # a_dst tile
            pl.BlockSpec((h, n_src), lambda i: (0, 0)),       # a_src (full)
            pl.BlockSpec((n_src, h * c), lambda i: (0, 0)),   # xs (full, bf16)
            pl.BlockSpec((1, out_cols), lambda i: (0, 0)),    # bias
        ],
        out_specs=pl.BlockSpec((t, out_cols), lambda i: (i, 0)),
        compiler_params=pltpu.CompilerParams(
            dimension_semantics=("parallel",),
            vmem_limit_bytes=_attn_vmem_limit(t, n_src, h, c)),
        cost_estimate=pl.CostEstimate(
            flops=int(2 * h * n_dst_p * n_src * c + 6 * h * n_dst_p * n_src),
            transcendentals=int(h * n_dst_p * n_src),
            bytes_accessed=int(2 * n_dst_p * n_src + 2 * n_src * h * c
                               + 4 * (h * n_src + n_dst_p * h + out_cols)
                               + 4 * n_dst_p * out_cols)),
    )(attn_bias, a_dst, a_src_h, xs, bias2)

    return out[:n_dst]


def gat_forward(x, adjs, params, *, hidden, heads, out_channels):
    """Mirror of GAT_PYG.forward over a list of (attn_bias, n_dst) hops."""
    num_layers = len(params)
    for i, (attn_bias, n_dst) in enumerate(adjs):
        if i != num_layers - 1:
            x = gat_conv(x, attn_bias, params[i], n_dst=n_dst, heads=heads,
                         out_ch=hidden, concat=True, apply_elu=True)
            # TODO(synk): F.dropout(p=0.5, training=True) has no deterministic
            # Pallas equivalent here; applied as identity (eval semantics).
        else:
            h_last = heads if num_layers == 1 else 1
            x = gat_conv(x, attn_bias, params[i], n_dst=n_dst, heads=h_last,
                         out_ch=out_channels, concat=False,
                         apply_log_softmax=True)
    return x


def init_params(key, in_ch, out_ch, hidden, heads):
    ks = jax.random.split(key, 6)

    def glorot(k, shape):
        lim = (6.0 / (shape[0] + shape[1])) ** 0.5
        return jax.random.uniform(k, shape, jnp.float32, -lim, lim)

    # Layer 0: GATConv(in_ch, hidden, heads=heads, concat=True)
    p0 = dict(
        w=glorot(ks[0], (in_ch, heads * hidden)),
        att_src=glorot(ks[1], (heads, hidden)),
        att_dst=glorot(ks[2], (heads, hidden)),
        bias=jnp.zeros((heads * hidden,), jnp.float32),
    )
    # Layer 1: GATConv(hidden*heads, out_ch, heads=1, concat=False)
    p1 = dict(
        w=glorot(ks[3], (heads * hidden, out_ch)),
        att_src=glorot(ks[4], (1, out_ch)),
        att_dst=glorot(ks[5], (1, out_ch)),
        bias=jnp.zeros((out_ch,), jnp.float32),
    )
    return [p0, p1]


def edges_to_attn_bias(src, dst, n_src, n_dst):
    """Additive attention mask [n_dst, n_src] (bf16): 0.0 on edges (incl. self
    loops for the target nodes = first n_dst source nodes), -1e30 elsewhere."""
    mask = jnp.zeros((n_dst, n_src), jnp.bool_)
    mask = mask.at[dst, src].set(True)
    diag = jnp.arange(n_dst)
    mask = mask.at[diag, diag].set(True)
    return jnp.where(mask, 0.0, -1e30).astype(jnp.bfloat16)


if __name__ == "__main__":
    key = jax.random.PRNGKey(0)
    in_ch, hidden, heads, out_ch = 16, 8, 8, 8
    n0, n1, n2 = 32, 16, 8      # sampled node counts per hop (NeighborSampler)
    fanout = 4

    k_x, k_e0, k_e1, k_p = jax.random.split(key, 4)
    x = jax.random.normal(k_x, (n0, in_ch), jnp.float32)

    # Hop 0 bipartite edges: src in [0, n0) -> dst in [0, n1)
    e0_src = jax.random.randint(k_e0, (n1 * fanout,), 0, n0)
    e0_dst = jnp.repeat(jnp.arange(n1), fanout)
    # Hop 1 bipartite edges: src in [0, n1) -> dst in [0, n2)
    e1_src = jax.random.randint(k_e1, (n2 * fanout,), 0, n1)
    e1_dst = jnp.repeat(jnp.arange(n2), fanout)

    adj0 = edges_to_attn_bias(e0_src, e0_dst, n0, n1)
    adj1 = edges_to_attn_bias(e1_src, e1_dst, n1, n2)

    params = init_params(k_p, in_ch, out_ch, hidden, heads)

    out = gat_forward(x, [(adj0, n1), (adj1, n2)], params,
                      hidden=hidden, heads=heads, out_channels=out_ch)
    out = jax.block_until_ready(out)

    assert out.shape == (n2, out_ch)
    assert bool(jnp.all(jnp.isfinite(out)))
    print("KERNEL_OK")
</pallas_src>

<mosaic_0001>
module attributes {stable_mosaic.version = 11 : i64} {
  func.func @_linear_kernel(%arg0: i32, %arg1: memref<32x16xbf16, #tpu.memory_space<vmem>>, %arg2: memref<16x128xbf16, #tpu.memory_space<vmem>>, %arg3: memref<32x128xf32, #tpu.memory_space<vmem>>) attributes {dimension_semantics = [#tpu.dimension_semantics<parallel>], iteration_bounds = array<i64: 1>, scalar_prefetch = 0 : i64, scratch_operands = 0 : i64, tpu.core_type = #tpu.core_type<tc>, window_params = [{transform_indices = @transform_0, window_bounds = array<i64: 32, 16>}, {pipeline_mode = #tpu.pipeline_mode<synchronous>, transform_indices = @transform_1, window_bounds = array<i64: 16, 128>}, {transform_indices = @transform_2, window_bounds = array<i64: 32, 128>}]} {
    %c0 = arith.constant 0 : index
    %c0_0 = arith.constant 0 : index
    %0 = vector.load %arg1[%c0, %c0_0] : memref<32x16xbf16, #tpu.memory_space<vmem>>, vector<32x16xbf16>
    %c0_1 = arith.constant 0 : index
    %c0_2 = arith.constant 0 : index
    %1 = vector.load %arg2[%c0_1, %c0_2] : memref<16x128xbf16, #tpu.memory_space<vmem>>, vector<16x128xbf16>
    %cst = arith.constant dense<0.000000e+00> : vector<32x128xf32>
    %2 = tpu.matmul %0, %1, %cst {dimension_numbers = #tpu.dot_dimension_numbers<[1], [0], [0], [1], [0, 0, 1, 1], [], []>} : vector<32x16xbf16>, vector<16x128xbf16>, vector<32x128xf32> -> vector<32x128xf32>
    %c0_3 = arith.constant 0 : index
    %c0_4 = arith.constant 0 : index
    %3 = vector.load %arg3[%c0_3, %c0_4] : memref<32x128xf32, #tpu.memory_space<vmem>>, vector<32x128xf32>
    tpu.vector_store %arg3[%c0_3, %c0_4], %2 {strides = array<i32>} : memref<32x128xf32, #tpu.memory_space<vmem>>, vector<32x128xf32>,
    return
  }
  func.func @transform_0(%arg0: i32) -> (i32, i32) {
    %c0_i32 = arith.constant 0 : i32
    %c0_i32_0 = arith.constant 0 : i32
    return %arg0, %c0_i32 : i32, i32
  }
  func.func @transform_1(%arg0: i32) -> (i32, i32) {
    %c0_i32 = arith.constant 0 : i32
    %c0_i32_0 = arith.constant 0 : i32
    %c0_i32_1 = arith.constant 0 : i32
    return %c0_i32, %c0_i32_0 : i32, i32
  }
  func.func @transform_2(%arg0: i32) -> (i32, i32) {
    %c0_i32 = arith.constant 0 : i32
    %c0_i32_0 = arith.constant 0 : i32
    return %arg0, %c0_i32 : i32, i32
  }
}

</mosaic_0001>

<bundles_post_ra>
// kernel: tpu_custom_call.1
= control target key start
LH: loop header
LB: loop body
LE: loop exit
PB: predicated region body
PF: predicated region fallthrough
CT: control target
= control target key end

     0   :  { %vm35_vm0 = vcmask 130048   ;;  %s183_s0 = inlined_call_operand.vmem [shape: bf16[32,16], index: 0, kind: input, shape index: {}]   ;;  %s184_s1 = inlined_call_operand.vmem [shape: bf16[16,128], index: 1, kind: input, shape index: {}]   ;;  %s185_s2 = inlined_call_operand.hbm [shape: f32[32,128], index: 2, kind: output, shape index: {}]  }
   0x1   :  { %v128_v0 = vld [vmem:[%s184_s1] sm:$0xff]   ;;  %v130_v2 = vld [vmem:[%s183_s0 + $0x8] sm:$0xff]  }
   0x2   :  { %v129_v1 = vld [vmem:[%s183_s0] sm:$0xff]   ;;  %119 = vmatprep.subr.bf16.mxu0 %v128_v0 }
   0x3   :  { %120 = vmatpush3.bf16.msra.mxu0 %v128_v0  ;;  %121 = vmatprep.mubr.msk.bf16.mxu0 %vm35_vm0, %v129_v1 }
   0x4   :  { %7 = vsyncpa [#allocation3], 0  ;;  %s153_s15 = smov [#allocation2]  }
   0x5   :  { %s100_s16 = sshll.u32 %s153_s15, 4  ;;  %s101_s16 = int_to_ptr.vmem [resolvable:$true] %s100_s16 }
   0x6   :  { %122 = vmatmul.mubr.msk.bf16.vlgmr.msra.gmra.mxu0 %vm35_vm0, %v130_v2  ;;  %s131_s1 = scalar_lea.vmem %s101_s16, 512  ;;  %p136_p1 = scmp.lt.s32.totalorder %s101_s16, %s101_s16 }
   0x7   :  { %p132_p0 = scmp.ne.s32.totalorder %s101_s16, %s131_s1  ;;  %p137_p2 = scmp.lt.s32.totalorder %s131_s1, %s131_s1 }
   0x9   :  { %p138_p3 = por %p137_p2, %p136_p1 }
   0xb   :  { %p139_p4 = pnand %p138_p3, %p132_p0 }
  0xc6   :  { %v123_v3 = vpop.f32.mrf.mxu0 }
  0xc7   :  { %93 = vst [vmem:[#allocation2 + $0x10] sm:$0xff] %v123_v3 }
  0xc8   :  { %v76_v4 = vpop.f32.mrf.mxu0 }
  0xc9   :  { %91 = vst [vmem:[#allocation2] sm:$0xff] %v76_v4 }
  0xca   :  { %v124_v5 = vpop.f32.mrf.mxu0 }
  0xcb   :  { %94 = vst [vmem:[#allocation2 + $0x18] sm:$0xff] %v124_v5 }
  0xcc   :  { %v79_v6 = vpop.f32.mrf.mxu0 }
  0xcd   :  { %92 = vst [vmem:[#allocation2 + $0x8] sm:$0xff] %v79_v6 }
  0xce   :  { %142 = shalt.err (!%p139_p4)
}
  0xcf   :  { %s154_s0 = smov 128   ;;  %s155_s17 = smov 8  }
  0xd0   :  { %106 = dma.vmem_to_hbm [thread:$0]  %s101_s16, 512, %s185_s2, [#allocation3], %s154_s0, %s154_s0, %s155_s17  }
  0xd1   :  { %151 = dma.done.wait [#allocation3], 512  }
  0xd2   :  { %152 = vsyncadd [#allocation3], 4294966784 }
  0xd3   :  { %110 = vsyncpa [#allocation3], 1 }

</bundles_post_ra>
